<compile_context>
chip_gen: v7x
topology: tpu7x:2x2x1
jax: 0.10.0
libtpu: 0.0.40
codegen_flags: <defaults>
</compile_context>

<pallas_src>
import functools

import jax
import jax.numpy as jnp
from jax.experimental import pallas as pl
from jax.experimental.pallas import tpu as pltpu


def _round_up(x, m):
    return ((x + m - 1) // m) * m


def _ffn_kernel(x_ref, w1_ref, b1_ref, w2_ref, b2_ref, o_ref, acc_ref):
    # Grid = (row tiles, F blocks); axis 1 is the reduction over F blocks.
    k = pl.program_id(1)

    @pl.when(k == 0)
    def _():
        acc_ref[...] = jnp.zeros_like(acc_ref)

    # First linear block: (tm, E) @ (E, tf) -> f32 accumulate, bias, ReLU.
    h = jnp.dot(x_ref[...], w1_ref[...], preferred_element_type=jnp.float32)
    h = jnp.maximum(h + b1_ref[...], 0.0)

    # Second linear block contribution: (tm, tf) @ (tf, E), accumulated in f32.
    acc_ref[...] += jnp.dot(h.astype(w2_ref.dtype), w2_ref[...],
                            preferred_element_type=jnp.float32)

    @pl.when(k == pl.num_programs(1) - 1)
    def _():
        # Dropout(p) in eval mode == identity.
        o_ref[...] = (acc_ref[...] + b2_ref[...]).astype(o_ref.dtype)


@functools.partial(jax.jit, static_argnames=("tile_m", "tile_f", "compute_dtype"))
def feed_forward_network(x, w1, b1, w2, b2, *, tile_m=512, tile_f=1024,
                         compute_dtype=None):
    """x: (B, T, E) -> (B, T, E), matching torch FeedForwardNetwork.forward (eval)."""
    B, T, E = x.shape
    Ein, F = w1.shape
    assert Ein == E and w2.shape == (F, E)

    out_dtype = x.dtype
    cdt = out_dtype if compute_dtype is None else compute_dtype
    itemsize = jnp.dtype(cdt).itemsize
    out_itemsize = jnp.dtype(out_dtype).itemsize

    M = B * T
    x2d = x.reshape(M, E).astype(cdt)
    w1c = w1.astype(cdt)
    w2c = w2.astype(cdt)
    b1f = jnp.reshape(b1, (1, F)).astype(jnp.float32)
    b2f = jnp.reshape(b2, (1, E)).astype(jnp.float32)

    # Row tile: big (MXU/pipeline friendly), rounded to the sublane quantum,
    # clamped for tiny M.  Rows are zero-padded to a whole number of tiles.
    sub = 8 if itemsize >= 4 else 16
    tm = min(tile_m, _round_up(M, sub))
    tm = max(sub, _round_up(tm, sub))
    M_pad = _round_up(M, tm)
    if M_pad != M:
        x2d = jnp.pad(x2d, ((0, M_pad - M), (0, 0)))

    # Feedforward-dim block: full F when small, else a multiple of 128 lanes.
    # Zero-padded hidden units contribute exactly zero to the output.
    if F <= tile_f:
        tf, F_pad = F, F
    else:
        tf = max(128, (tile_f // 128) * 128)
        F_pad = _round_up(F, tf)
    if F_pad != F:
        w1c = jnp.pad(w1c, ((0, 0), (0, F_pad - F)))
        b1f = jnp.pad(b1f, ((0, 0), (0, F_pad - F)))
        w2c = jnp.pad(w2c, ((0, F_pad - F), (0, 0)))

    grid = (M_pad // tm, F_pad // tf)

    # VMEM budget: double-buffered pipeline tiles + f32 accumulator scratch.
    vmem_bytes = (2 * tm * E * itemsize        # x tiles
                  + 2 * tm * E * out_itemsize  # out tiles
                  + 2 * E * tf * itemsize      # W1 blocks
                  + 2 * tf * 4                 # b1 blocks
                  + 2 * tf * E * itemsize      # W2 blocks
                  + 2 * E * 4                  # b2
                  + tm * E * 4)                # accumulator
    vmem_limit = max(int(vmem_bytes) + (4 << 20), 32 << 20)

    cost = pl.CostEstimate(
        flops=4 * M * E * F,
        transcendentals=0,
        bytes_accessed=(2 * M * E * itemsize      # x in, out
                        + 2 * E * F * itemsize    # W1, W2
                        + (F + E) * 4),           # biases
    )

    out2d = pl.pallas_call(
        _ffn_kernel,
        out_shape=jax.ShapeDtypeStruct((M_pad, E), out_dtype),
        grid_spec=pltpu.PrefetchScalarGridSpec(
            num_scalar_prefetch=0,
            grid=grid,
            in_specs=[
                pl.BlockSpec((tm, E), lambda i, k: (i, 0)),   # x row tile
                pl.BlockSpec((E, tf), lambda i, k: (0, k)),   # W1 column block
                pl.BlockSpec((1, tf), lambda i, k: (0, k)),   # b1 block
                pl.BlockSpec((tf, E), lambda i, k: (k, 0)),   # W2 row block
                pl.BlockSpec((1, E), lambda i, k: (0, 0)),    # b2
            ],
            out_specs=pl.BlockSpec((tm, E), lambda i, k: (i, 0)),
            scratch_shapes=[pltpu.VMEM((tm, E), jnp.float32)],
        ),
        compiler_params=pltpu.CompilerParams(
            dimension_semantics=("parallel", "arbitrary"),
            vmem_limit_bytes=vmem_limit,
        ),
        cost_estimate=cost,
    )(x2d, w1c, b1f, w2c, b2f)

    return out2d[:M].reshape(B, T, E)


def _init_params(key, dim_embedding, dim_feedforward, dtype=jnp.float32):
    """Deterministic init mimicking nn.Linear's uniform(-1/sqrt(fan_in), 1/sqrt(fan_in))."""
    k1, k2, k3, k4 = jax.random.split(key, 4)
    lim1 = 1.0 / (dim_embedding ** 0.5)
    lim2 = 1.0 / (dim_feedforward ** 0.5)
    # Stored as (in_dim, out_dim) so the kernel does x @ W directly.
    w1 = jax.random.uniform(k1, (dim_embedding, dim_feedforward),
                            minval=-lim1, maxval=lim1, dtype=dtype)
    b1 = jax.random.uniform(k2, (1, dim_feedforward),
                            minval=-lim1, maxval=lim1, dtype=dtype)
    w2 = jax.random.uniform(k3, (dim_feedforward, dim_embedding),
                            minval=-lim2, maxval=lim2, dtype=dtype)
    b2 = jax.random.uniform(k4, (1, dim_embedding),
                            minval=-lim2, maxval=lim2, dtype=dtype)
    return w1, b1, w2, b2


if __name__ == "__main__":
    batch, seq = 2, 8
    dim_embedding, dim_feedforward = 32, 64
    prob_dropout = 0.1  # identity in eval mode

    # NOTE: E=32 / F=64 are toy sizes; lane-dense (multiple-of-128) E and F are
    # what the kernel is tiled for at real transformer shapes.

    key = jax.random.PRNGKey(0)
    kx, kp = jax.random.split(key)
    x = jax.random.normal(kx, (batch, seq, dim_embedding), dtype=jnp.float32)
    w1, b1, w2, b2 = _init_params(kp, dim_embedding, dim_feedforward)

    # f32 path (exact vs reference).
    out = feed_forward_network(x, w1, b1, w2, b2)
    out = jax.block_until_ready(out)

    ref = jnp.maximum(x.reshape(-1, dim_embedding) @ w1 + b1, 0.0) @ w2 + b2
    ref = ref.reshape(batch, seq, dim_embedding)
    assert out.shape == (batch, seq, dim_embedding)
    assert jnp.allclose(out, ref, atol=1e-5, rtol=1e-5)

    # bf16-operand / f32-accumulate path (peak MXU rate, halved weight DMA).
    out_bf16 = feed_forward_network(x, w1, b1, w2, b2, compute_dtype=jnp.bfloat16)
    out_bf16 = jax.block_until_ready(out_bf16)
    assert jnp.allclose(out_bf16, ref, atol=5e-2, rtol=5e-2)

    print("KERNEL_OK")
</pallas_src>

<mosaic_0001>
module attributes {stable_mosaic.version = 11 : i64} {
  func.func @_ffn_kernel(%arg0: i32, %arg1: i32, %arg2: memref<16x32xf32, #tpu.memory_space<vmem>>, %arg3: memref<32x64xf32, #tpu.memory_space<vmem>>, %arg4: memref<1x64xf32, #tpu.memory_space<vmem>>, %arg5: memref<64x32xf32, #tpu.memory_space<vmem>>, %arg6: memref<1x32xf32, #tpu.memory_space<vmem>>, %arg7: memref<16x32xf32, #tpu.memory_space<vmem>>, %arg8: memref<16x32xf32, #tpu.memory_space<vmem>>) attributes {dimension_semantics = [#tpu.dimension_semantics<parallel>, #tpu.dimension_semantics<arbitrary>], iteration_bounds = array<i64: 1, 1>, scalar_prefetch = 0 : i64, scratch_operands = 1 : i64, tpu.core_type = #tpu.core_type<tc>, window_params = [{transform_indices = @transform_0, window_bounds = array<i64: 16, 32>}, {transform_indices = @transform_1, window_bounds = array<i64: 32, 64>}, {transform_indices = @transform_2, window_bounds = array<i64: 1, 64>}, {transform_indices = @transform_3, window_bounds = array<i64: 64, 32>}, {pipeline_mode = #tpu.pipeline_mode<synchronous>, transform_indices = @transform_4, window_bounds = array<i64: 1, 32>}, {transform_indices = @transform_5, window_bounds = array<i64: 16, 32>}]} {
    %c0_i32 = arith.constant 0 : i32
    %0 = arith.cmpi eq, %arg1, %c0_i32 : i32
    %1 = arith.extui %0 : i1 to i32
    %c0_i32_0 = arith.constant 0 : i32
    %2 = arith.cmpi ne, %1, %c0_i32_0 : i32
    scf.if %2 {
      %cst_16 = arith.constant 0.000000e+00 : f32
      %19 = vector.broadcast %cst_16 : f32 to vector<16x32xf32>
      %c0_17 = arith.constant 0 : index
      %c0_18 = arith.constant 0 : index
      %20 = vector.load %arg8[%c0_17, %c0_18] : memref<16x32xf32, #tpu.memory_space<vmem>>, vector<16x32xf32>
      tpu.vector_store %arg8[%c0_17, %c0_18], %19 {strides = array<i32>} : memref<16x32xf32, #tpu.memory_space<vmem>>, vector<16x32xf32>,
    } else {
    }
    %c0 = arith.constant 0 : index
    %c0_1 = arith.constant 0 : index
    %3 = vector.load %arg2[%c0, %c0_1] : memref<16x32xf32, #tpu.memory_space<vmem>>, vector<16x32xf32>
    %c0_2 = arith.constant 0 : index
    %c0_3 = arith.constant 0 : index
    %4 = vector.load %arg3[%c0_2, %c0_3] : memref<32x64xf32, #tpu.memory_space<vmem>>, vector<32x64xf32>
    %cst = arith.constant dense<0.000000e+00> : vector<16x64xf32>
    %5 = tpu.matmul %3, %4, %cst {dimension_numbers = #tpu.dot_dimension_numbers<[1], [0], [0], [1], [0, 0, 1, 1], [], []>} : vector<16x32xf32>, vector<32x64xf32>, vector<16x64xf32> -> vector<16x64xf32>
    %c0_4 = arith.constant 0 : index
    %c0_5 = arith.constant 0 : index
    %6 = vector.load %arg4[%c0_4, %c0_5] : memref<1x64xf32, #tpu.memory_space<vmem>>, vector<1x64xf32>
    %7 = vector.broadcast %6 : vector<1x64xf32> to vector<16x64xf32>
    %8 = arith.addf %5, %7 : vector<16x64xf32>
    %cst_6 = arith.constant 0.000000e+00 : f32
    %9 = vector.broadcast %cst_6 : f32 to vector<16x64xf32>
    %10 = arith.maximumf %8, %9 : vector<16x64xf32>
    %c0_7 = arith.constant 0 : index
    %c0_8 = arith.constant 0 : index
    %11 = vector.load %arg8[%c0_7, %c0_8] : memref<16x32xf32, #tpu.memory_space<vmem>>, vector<16x32xf32>
    %c0_9 = arith.constant 0 : index
    %c0_10 = arith.constant 0 : index
    %12 = vector.load %arg5[%c0_9, %c0_10] : memref<64x32xf32, #tpu.memory_space<vmem>>, vector<64x32xf32>
    %cst_11 = arith.constant dense<0.000000e+00> : vector<16x32xf32>
    %13 = tpu.matmul %10, %12, %cst_11 {dimension_numbers = #tpu.dot_dimension_numbers<[1], [0], [0], [1], [0, 0, 1, 1], [], []>} : vector<16x64xf32>, vector<64x32xf32>, vector<16x32xf32> -> vector<16x32xf32>
    %14 = arith.addf %11, %13 : vector<16x32xf32>
    %c0_12 = arith.constant 0 : index
    %c0_13 = arith.constant 0 : index
    %15 = vector.load %arg8[%c0_12, %c0_13] : memref<16x32xf32, #tpu.memory_space<vmem>>, vector<16x32xf32>
    tpu.vector_store %arg8[%c0_12, %c0_13], %14 {strides = array<i32>} : memref<16x32xf32, #tpu.memory_space<vmem>>, vector<16x32xf32>,
    %c0_i32_14 = arith.constant 0 : i32
    %16 = arith.cmpi eq, %arg1, %c0_i32_14 : i32
    %17 = arith.extui %16 : i1 to i32
    %c0_i32_15 = arith.constant 0 : i32
    %18 = arith.cmpi ne, %17, %c0_i32_15 : i32
    scf.if %18 {
      %c0_16 = arith.constant 0 : index
      %c0_17 = arith.constant 0 : index
      %19 = vector.load %arg8[%c0_16, %c0_17] : memref<16x32xf32, #tpu.memory_space<vmem>>, vector<16x32xf32>
      %c0_18 = arith.constant 0 : index
      %c0_19 = arith.constant 0 : index
      %20 = vector.load %arg6[%c0_18, %c0_19] : memref<1x32xf32, #tpu.memory_space<vmem>>, vector<1x32xf32>
      %21 = vector.broadcast %20 : vector<1x32xf32> to vector<16x32xf32>
      %22 = arith.addf %19, %21 : vector<16x32xf32>
      %c0_20 = arith.constant 0 : index
      %c0_21 = arith.constant 0 : index
      %23 = vector.load %arg7[%c0_20, %c0_21] : memref<16x32xf32, #tpu.memory_space<vmem>>, vector<16x32xf32>
      tpu.vector_store %arg7[%c0_20, %c0_21], %22 {strides = array<i32>} : memref<16x32xf32, #tpu.memory_space<vmem>>, vector<16x32xf32>,
    } else {
    }
    return
  }
  func.func @transform_0(%arg0: i32, %arg1: i32) -> (i32, i32) {
    %c0_i32 = arith.constant 0 : i32
    %c0_i32_0 = arith.constant 0 : i32
    return %arg0, %c0_i32 : i32, i32
  }
  func.func @transform_1(%arg0: i32, %arg1: i32) -> (i32, i32) {
    %c0_i32 = arith.constant 0 : i32
    %c0_i32_0 = arith.constant 0 : i32
    return %c0_i32, %arg1 : i32, i32
  }
  func.func @transform_2(%arg0: i32, %arg1: i32) -> (i32, i32) {
    %c0_i32 = arith.constant 0 : i32
    %c0_i32_0 = arith.constant 0 : i32
    return %c0_i32, %arg1 : i32, i32
  }
  func.func @transform_3(%arg0: i32, %arg1: i32) -> (i32, i32) {
    %c0_i32 = arith.constant 0 : i32
    %c0_i32_0 = arith.constant 0 : i32
    return %arg1, %c0_i32 : i32, i32
  }
  func.func @transform_4(%arg0: i32, %arg1: i32) -> (i32, i32) {
    %c0_i32 = arith.constant 0 : i32
    %c0_i32_0 = arith.constant 0 : i32
    %c0_i32_1 = arith.constant 0 : i32
    return %c0_i32, %c0_i32_0 : i32, i32
  }
  func.func @transform_5(%arg0: i32, %arg1: i32) -> (i32, i32) {
    %c0_i32 = arith.constant 0 : i32
    %c0_i32_0 = arith.constant 0 : i32
    return %arg0, %c0_i32 : i32, i32
  }
}

</mosaic_0001>

<bundles_post_ra>
// kernel: feed_forward_network.1
= control target key start
LH: loop header
LB: loop body
LE: loop exit
PB: predicated region body
PF: predicated region fallthrough
CT: control target
= control target key end

     0   :  { %vm25_vm0 = vcmask 261120   ;;  %s459_s0 = inlined_call_operand.vmem [shape: f32[16,32], index: 0, kind: input, shape index: {}]   ;;  %s460_s1 = inlined_call_operand.vmem [shape: f32[32,64], index: 1, kind: input, shape index: {}]   ;;  %s461_s2 = inlined_call_operand.vmem [shape: f32[1,64], index: 2, kind: input, shape index: {}]   ;;  %s462_s3 = inlined_call_operand.vmem [shape: f32[64,32], index: 3, kind: input, shape index: {}]   ;;  %s463_s4 = inlined_call_operand.vmem [shape: f32[1,32], index: 4, kind: input, shape index: {}]   ;;  %s464_s5 = inlined_call_operand.hbm [shape: f32[16,32], index: 5, kind: output, shape index: {}]  }
   0x1   :  { %v30_v0 = vld [vmem:[%s460_s1] sm:$0xff]  ;;  %v31_v1 = vld [vmem:[%s460_s1 + $0x8] sm:$0xff]  ;;  %v32_v2 = vld [vmem:[%s460_s1 + $0x10] sm:$0xff] }
   0x2   :  { %v305_v3 = vpack.c.bf16 %v31_v1, %v30_v0  ;;  %v33_v4 = vld [vmem:[%s460_s1 + $0x18] sm:$0xff]  ;;  %v28_v5 = vld [vmem:[%s459_s0] sm:$0xff]  ;;  %v128_v8 = vld [vmem:[%s462_s3 + $0x8] sm:$0xff] }
   0x3   :  { %v309_v6 = vpack.c.bf16 %v33_v4, %v32_v2  ;;  %283 = vmatprep.mubr.msk.f32.mxu0 %vm25_vm0, %v28_v5  ;;  %v127_v7 = vld [vmem:[%s462_s3] sm:$0xff]  ;;  %v129_v9 = vld [vmem:[%s462_s3 + $0x10] sm:$0xff]  ;;  %v130_v11 = vld [vmem:[%s462_s3 + $0x18] sm:$0xff] }
   0x4   :  { %306 = vmatprep.subr.bf16.mxu0 %v305_v3  ;;  %v313_v10 = vpack.c.bf16 %v128_v8, %v127_v7  ;;  %v317_v12 = vpack.c.bf16 %v130_v11, %v129_v9  ;;  %v131_v13 = vld [vmem:[%s462_s3 + $0x20] sm:$0xff]  ;;  %v132_v14 = vld [vmem:[%s462_s3 + $0x28] sm:$0xff] }
   0x5   :  { %308 = vmatpush3.bf16.msra.mxu0 %v305_v3 }
   0x6   :  { %10 = vsyncpa [#allocation4], 0  ;;  %310 = vmatprep.subr.bf16.mxu0 %v309_v6  ;;  %314 = vmatprep.subr.bf16.mxu1 %v313_v10  ;;  %v321_v15 = vpack.c.bf16 %v132_v14, %v131_v13  ;;  %v29_v16 = vld [vmem:[%s459_s0 + $0x8] sm:$0xff]  ;;  %v133_v17 = vld [vmem:[%s462_s3 + $0x30] sm:$0xff]  ;;  %v357_v20 = vmov 0.0   ;;  %vm135_vm1 = vcmask 523264  }
   0x7   :  { %316 = vmatpush3.bf16.msra.mxu1 %v313_v10  ;;  %v134_v18 = vld [vmem:[%s462_s3 + $0x38] sm:$0xff]  ;;  %27 = vst.msk [vmem:[#allocation2 + $0x8] sm:$0xff] %vm25_vm0, %v357_v20  ;;  %26 = vst.msk [vmem:[#allocation2] sm:$0xff] %vm25_vm0, %v357_v20  ;;  %v253_v21 = vld [vmem:[%s461_s2] ss:$0 sm:$0xff]  ;;  %s358_s21 = smov [#allocation3]  }
   0x8   :  { %318 = vmatprep.subr.bf16.mxu1 %v317_v12  ;;  %v325_v19 = vpack.c.bf16 %v134_v18, %v133_v17  ;;  %v258_v34 = vld [vmem:[%s463_s4] ss:$0 sm:$0xff]  ;;  %s242_s22 = sshll.u32 %s358_s21, 4  ;;  %s243_s22 = int_to_ptr.vmem [resolvable:$true] %s242_s22 }
   0x9   :  { %312 = vmatpush3.bf16.msra.mxu0 %v309_v6  ;;  %s333_s23 = scalar_lea.vmem %s243_s22, 256  ;;  %p338_p1 = scmp.lt.s32.totalorder %s243_s22, %s243_s22 }
   0xa   :  { %p334_p0 = scmp.ne.s32.totalorder %s243_s22, %s333_s23  ;;  %p339_p2 = scmp.lt.s32.totalorder %s333_s23, %s333_s23 }
   0xb   :  { %320 = vmatpush3.bf16.msra.mxu1 %v317_v12 }
   0xc   :  { %284 = vmatmul.mubr.msk.f32.vlgmr.msra.gmra.mrb[0].mxu0 %vm25_vm0, %v29_v16  ;;  %322 = vmatprep.subr.bf16.mxu1 %v321_v15  ;;  %p340_p3 = por %p339_p2, %p338_p1 }
   0xe   :  { %v126_v28 = vld [vmem:[#allocation2 + $0x8] sm:$0xff]  ;;  %v125_v29 = vld [vmem:[#allocation2] sm:$0xff]  ;;  %p341_p4 = pnand %p340_p3, %p334_p0 }
   0xf   :  { %324 = vmatpush3.bf16.msra.mxu1 %v321_v15 }
  0x10   :  { %326 = vmatprep.subr.bf16.mxu1 %v325_v19 }
  0x13   :  { %328 = vmatpush3.bf16.msra.mxu1 %v325_v19 }
  0xdf   :  { %v285_v22 = vpop.f32.mrb[0].mxu0 }
  0xe0   :  { %v120_v23 = vadd.f32 %v285_v22, %v253_v21  ;;  %v114_v24 = vpop.f32.mrb[1].mxu0 }
  0xe1   :  { %v115_v25 = vadd.f32 %v253_v21, %v114_v24 }
  0xe2   :  { %v124_v27 = vmax.f32 %v120_v23, 0.0 }
  0xe3   :  { %v123_v26 = vmax.f32 %v115_v25, 0.0 }
  0xe5   :  { %302 = vmatprep.mubr.msk.f32.mxu1 %vm135_vm1, %v123_v26 }
  0xe6   :  { %303 = vmatmul.mubr.msk.f32.vlgmr.msra.gmra.mrb[0].mxu1 %vm135_vm1, %v124_v27 }
 0x1b9   :  { %v304_v30 = vpop.f32.mrb[0].mxu1 }
 0x1ba   :  { %v218_v31 = vadd.f32 %v304_v30, %v126_v28  ;;  %v208_v32 = vpop.f32.mrb[1].mxu1 }
 0x1bb   :  { %v217_v33 = vadd.f32 %v208_v32, %v125_v29 }
 0x1bc   :  { %220 = vst.msk [vmem:[#allocation2 + $0x8] sm:$0xff] %vm25_vm0, %v218_v31 }
 0x1bd   :  { %219 = vst.msk [vmem:[#allocation2] sm:$0xff] %vm25_vm0, %v217_v33 }
 0x1c3   :  { %v225_v35 = vld [vmem:[#allocation2 + $0x8] sm:$0xff] }
 0x1c4   :  { %v224_v36 = vld [vmem:[#allocation2] sm:$0xff]  ;;  %v234_v37 = vadd.f32 %v258_v34, %v225_v35 }
 0x1c5   :  { %v233_v38 = vadd.f32 %v258_v34, %v224_v36 }
 0x1c6   :  { %236 = vst.msk [vmem:[#allocation3 + $0x8] sm:$0xff] %vm25_vm0, %v234_v37 }
 0x1c7   :  { %235 = vst.msk [vmem:[#allocation3] sm:$0xff] %vm25_vm0, %v233_v38 }
 0x1c8   :  { %344 = shalt.err (!%p341_p4)
}
 0x1c9   :  { %s345_s25 = scalar_lea.hbm %s464_s5, 256 }
 0x1ca   :  { %p346_p5 = scmp.ne.s32.totalorder %s464_s5, %s345_s25  ;;  %p349_p6 = scmp.lt.u32.totalorder %s345_s25, %s464_s5 }
 0x1cc   :  { %p351_p7 = pnand %p349_p6, %p346_p5 }
 0x1ce   :  { %354 = shalt.err (!%p351_p7)
}
 0x1cf   :  { %s359_s30 = smov 128   ;;  %s360_s6 = smov 8  }
 0x1d0   :  { %248 = dma.vmem_to_hbm [thread:$0]  %s243_s22, 256, %s464_s5, [#allocation4], %s359_s30, %s359_s30, %s360_s6  }
 0x1d1   :  { %355 = dma.done.wait [#allocation4], 256  }
 0x1d2   :  { %356 = vsyncadd [#allocation4], 4294967040 }
 0x1d3   :  { %252 = vsyncpa [#allocation4], 1 }

</bundles_post_ra>
